<compile_context>
chip_gen: v6e
topology: v6e:2x2x1
jax: 0.10.0
libtpu: 0.0.40
codegen_flags: <defaults>
</compile_context>

<pallas_src>
import functools

import jax
import jax.numpy as jnp
from jax.experimental import pallas as pl
from jax.experimental.pallas import tpu as pltpu


def _attention_kernel(x_ref, wqkv_ref, wout_ref, o_ref, k_scr, v_scr, *,
                      heads, dim_head, q_tile):
    """Fused QKV projection + per-head softmax attention + output projection.

    x_ref    : (1, N, D)          bf16  -- all tokens of the current batch element
    wqkv_ref : (3, H, D, Dh)      bf16  -- [q|k|v] weights, heads on leading axis,
                                           softmax scale already folded into [0]
    wout_ref : (H*Dh, D)          bf16  -- output projection (head-major rows)
    o_ref    : (1, TQ, D)         f32   -- output rows for this (batch, q-tile)
    k_scr    : (H, N, Dh)         bf16  -- VMEM scratch, persists across q tiles
    v_scr    : (H, N, Dh)         bf16  -- VMEM scratch, persists across q tiles
    """
    qi = pl.program_id(1)
    n = x_ref.shape[1]

    # --- K/V projection: once per batch element.  The q-tile axis is marked
    #     "arbitrary", so scratch written at qi==0 is reused by later q tiles.
    @pl.when(qi == 0)
    def _project_kv():
        x_all = x_ref[0]                                         # (N, D) bf16
        for h in range(heads):                                   # static unroll (H small)
            k_scr[h] = jnp.dot(x_all, wqkv_ref[1, h],
                               preferred_element_type=jnp.float32
                               ).astype(k_scr.dtype)             # (N, Dh) bf16
            v_scr[h] = jnp.dot(x_all, wqkv_ref[2, h],
                               preferred_element_type=jnp.float32
                               ).astype(v_scr.dtype)             # (N, Dh) bf16

    # --- Q projection inputs: only the rows of the current q tile ---
    if q_tile == n:
        x_rows = x_ref[0]                                        # (TQ, D) bf16
    else:
        row0 = pl.multiple_of(qi * q_tile, q_tile)
        x_rows = x_ref[0, pl.ds(row0, q_tile), :]                # (TQ, D) bf16

    # --- per-head attention; heads are leading-axis indices (no lane slicing).
    # TODO(synk): for very large head counts, switch to lax.fori_loop with a VMEM
    # accumulator to bound live ranges; static unroll is fine for typical H<=16.
    outs = []
    for h in range(heads):
        q_h = jnp.dot(x_rows, wqkv_ref[0, h],
                      preferred_element_type=jnp.float32
                      ).astype(jnp.bfloat16)                     # (TQ, Dh) bf16 (pre-scaled)
        k_h = k_scr[h]                                           # (N, Dh) bf16
        v_h = v_scr[h]                                           # (N, Dh) bf16

        # Scores: contract Dh of both operands (no explicit K transpose).
        s = jnp.einsum('qd,kd->qk', q_h, k_h,
                       preferred_element_type=jnp.float32)       # (TQ, N) f32

        # Numerically-stable softmax in f32; approx reciprocal -> EUP slot.
        s_max = jnp.max(s, axis=-1, keepdims=True)
        p = jnp.exp(s - s_max)
        p = p * pl.reciprocal(jnp.sum(p, axis=-1, keepdims=True), approx=True)

        o_h = jnp.dot(p.astype(jnp.bfloat16), v_h,
                      preferred_element_type=jnp.float32)        # (TQ, Dh) f32
        outs.append(o_h)

    # --- merge heads once (head-major concat == 'b h n d -> b n (h d)') and run
    #     a single wide-contraction output projection: (TQ, H*Dh) @ (H*Dh, D).
    o_cat = jnp.concatenate(outs, axis=-1).astype(jnp.bfloat16)  # (TQ, H*Dh) bf16
    out = jnp.dot(o_cat, wout_ref[...],
                  preferred_element_type=jnp.float32)            # (TQ, D) f32
    o_ref[0] = out.astype(o_ref.dtype)


def attention_forward(x, w_qkv, w_out, *, heads, dim_head, q_tile=None):
    """x: (B, N, D) f32, w_qkv: (D, 3*H*Dh), w_out: (H*Dh, D) -> (B, N, D) f32."""
    B, N, D = x.shape
    inner = heads * dim_head
    assert w_qkv.shape == (D, 3 * inner) and w_out.shape == (inner, D)
    scale = float(dim_head) ** -0.5

    # Query tiling: one tile for typical ViT sequence lengths; 256-row tiles fill
    # the 256-deep v6e/v7x MXU for long sequences (use q_tile=128 on v5e).
    if q_tile is None:
        q_tile = N if N <= 512 else 256
    assert N % q_tile == 0, "TODO(synk): pad/mask ragged query tiles"
    nq = N // q_tile

    # Heads onto a leading axis: (3, H, D, Dh).  Fold the softmax scale into the
    # Q slab on the host (one-time constant fold; removes a per-step VPU pass).
    w3 = jnp.asarray(w_qkv).reshape(D, 3, heads, dim_head)
    w3 = w3.at[:, 0, :, :].multiply(scale)
    wqkv_heads = jnp.transpose(w3, (1, 2, 0, 3)).astype(jnp.bfloat16)  # (3, H, D, Dh)

    # bf16 MXU operands; all accumulation and softmax math stays in f32 in-kernel.
    x_bf = x.astype(jnp.bfloat16)
    wout_bf = w_out.astype(jnp.bfloat16)                               # (inner, D)

    # Per-generation scoped-VMEM budget: ~3/4 of physical, capped at 96 MiB
    # (v7x: 48 of 64 MiB; v5e/v6e: 96 of 128 MiB).  Safe fallback: 32 MiB.
    try:
        vmem_cap = pltpu.get_tpu_info().vmem_capacity_bytes
        vmem_limit = int(min(vmem_cap * 3 // 4, 96 * 1024 * 1024))
    except Exception:
        vmem_limit = 32 * 1024 * 1024

    kernel = functools.partial(
        _attention_kernel, heads=heads, dim_head=dim_head, q_tile=q_tile)

    # NOTE: weight index maps are constant, so the blocks are DMA'd once per
    # revisit chain and held in VMEM.  pipeline_mode=pl.Buffered(1) would drop
    # the unused second buffer; omitted here for maximum compiler compatibility.
    # TODO(synk): for B=1 inference on v7x, add a parallel head/q-tile grid axis
    # so both TensorCores get work.
    return pl.pallas_call(
        kernel,
        out_shape=jax.ShapeDtypeStruct((B, N, D), x.dtype),
        grid_spec=pltpu.PrefetchScalarGridSpec(
            num_scalar_prefetch=0,
            grid=(B, nq),
            in_specs=[
                # Full token rows per batch element; index map ignores the q-tile
                # axis, so the block is NOT re-fetched across q tiles.
                pl.BlockSpec((1, N, D), lambda b, qi: (b, 0, 0)),
                # Weights: constant index maps -> DMA'd once, resident in VMEM.
                pl.BlockSpec((3, heads, D, dim_head), lambda b, qi: (0, 0, 0, 0)),
                pl.BlockSpec((inner, D), lambda b, qi: (0, 0)),
            ],
            out_specs=pl.BlockSpec((1, q_tile, D), lambda b, qi: (b, qi, 0)),
            scratch_shapes=[
                pltpu.VMEM((heads, N, dim_head), jnp.bfloat16),   # K slabs
                pltpu.VMEM((heads, N, dim_head), jnp.bfloat16),   # V slabs
            ],
        ),
        compiler_params=pltpu.CompilerParams(
            # q-tile axis MUST be "arbitrary": K/V scratch written at qi==0 is
            # reused by later q tiles of the same batch element.
            dimension_semantics=("parallel", "arbitrary"),
            vmem_limit_bytes=vmem_limit,
        ),
    )(x_bf, wqkv_heads, wout_bf)


def attention_reference(x, w_qkv, w_out, *, heads, dim_head):
    """Pure-JAX f32 reference matching the PyTorch forward."""
    B, N, D = x.shape
    inner = heads * dim_head
    scale = float(dim_head) ** -0.5
    qkv = x @ w_qkv
    q, k, v = jnp.split(qkv, 3, axis=-1)

    def split_heads(t):
        return jnp.transpose(t.reshape(B, N, heads, dim_head), (0, 2, 1, 3))

    q, k, v = map(split_heads, (q, k, v))
    dots = jnp.einsum('bhnd,bhmd->bhnm', q, k) * scale
    attn = jax.nn.softmax(dots, axis=-1)
    out = jnp.einsum('bhnm,bhmd->bhnd', attn, v)
    out = jnp.transpose(out, (0, 2, 1, 3)).reshape(B, N, inner)
    return out @ w_out


if __name__ == "__main__":
    # Small shapes consistent with the module: dim=32, heads=4, dim_head=16.
    B, N, D = 2, 8, 32
    heads, dim_head = 4, 16
    inner = heads * dim_head

    key = jax.random.PRNGKey(0)
    kx, kq, ko = jax.random.split(key, 3)
    x = jax.random.normal(kx, (B, N, D), dtype=jnp.float32)
    # Deterministic synthetic weights (nn.Linear with bias=False).
    w_qkv = jax.random.normal(kq, (D, 3 * inner), dtype=jnp.float32) * 0.05
    w_out = jax.random.normal(ko, (inner, D), dtype=jnp.float32) * 0.05

    out = attention_forward(x, w_qkv, w_out, heads=heads, dim_head=dim_head)
    out = jax.block_until_ready(out)

    ref = attention_reference(x, w_qkv, w_out, heads=heads, dim_head=dim_head)
    # Kernel uses bf16 MXU operands (f32 accumulation) + approx softmax
    # reciprocal -> bf16-level tolerance.
    assert jnp.allclose(out, ref, atol=2e-2, rtol=2e-2), "mismatch vs reference"

    print("KERNEL_OK")
</pallas_src>

<mosaic_0001>
module attributes {stable_mosaic.version = 11 : i64} {
  func.func @_attention_kernel(%arg0: i32, %arg1: i32, %arg2: memref<1x8x32xbf16, #tpu.memory_space<vmem>>, %arg3: memref<3x4x32x16xbf16, #tpu.memory_space<vmem>>, %arg4: memref<64x32xbf16, #tpu.memory_space<vmem>>, %arg5: memref<1x8x32xf32, #tpu.memory_space<vmem>>, %arg6: memref<4x8x16xbf16, #tpu.memory_space<vmem>>, %arg7: memref<4x8x16xbf16, #tpu.memory_space<vmem>>) attributes {dimension_semantics = [#tpu.dimension_semantics<parallel>, #tpu.dimension_semantics<arbitrary>], iteration_bounds = array<i64: 2, 1>, scalar_prefetch = 0 : i64, scratch_operands = 2 : i64, tpu.core_type = #tpu.core_type<tc>, window_params = [{transform_indices = @transform_0, window_bounds = array<i64: 1, 8, 32>}, {pipeline_mode = #tpu.pipeline_mode<synchronous>, transform_indices = @transform_1, window_bounds = array<i64: 3, 4, 32, 16>}, {pipeline_mode = #tpu.pipeline_mode<synchronous>, transform_indices = @transform_2, window_bounds = array<i64: 64, 32>}, {transform_indices = @transform_3, window_bounds = array<i64: 1, 8, 32>}]} {
    %c0_i32 = arith.constant 0 : i32
    %0 = arith.cmpi eq, %arg1, %c0_i32 : i32
    %1 = arith.extui %0 : i1 to i32
    %c0_i32_0 = arith.constant 0 : i32
    %2 = arith.cmpi ne, %1, %c0_i32_0 : i32
    scf.if %2 {
      %c0_65 = arith.constant 0 : index
      %c0_66 = arith.constant 0 : index
      %c0_67 = arith.constant 0 : index
      %96 = vector.load %arg2[%c0_65, %c0_66, %c0_67] : memref<1x8x32xbf16, #tpu.memory_space<vmem>>, vector<1x8x32xbf16>
      %97 = vector.shape_cast %96 : vector<1x8x32xbf16> to vector<8x32xbf16>
      %c1_68 = arith.constant 1 : index
      %c0_69 = arith.constant 0 : index
      %c0_70 = arith.constant 0 : index
      %c0_71 = arith.constant 0 : index
      %98 = vector.load %arg3[%c1_68, %c0_69, %c0_70, %c0_71] : memref<3x4x32x16xbf16, #tpu.memory_space<vmem>>, vector<1x1x32x16xbf16>
      %99 = vector.shape_cast %98 : vector<1x1x32x16xbf16> to vector<32x16xbf16>
      %cst_72 = arith.constant dense<0.000000e+00> : vector<8x16xf32>
      %100 = tpu.matmul %97, %99, %cst_72 {dimension_numbers = #tpu.dot_dimension_numbers<[1], [0], [0], [1], [0, 0, 1, 1], [], []>} : vector<8x32xbf16>, vector<32x16xbf16>, vector<8x16xf32> -> vector<8x16xf32>
      %101 = arith.truncf %100 : vector<8x16xf32> to vector<8x16xbf16>
      %c0_73 = arith.constant 0 : index
      %c0_74 = arith.constant 0 : index
      %c0_75 = arith.constant 0 : index
      %102 = vector.load %arg6[%c0_73, %c0_74, %c0_75] : memref<4x8x16xbf16, #tpu.memory_space<vmem>>, vector<1x8x16xbf16>
      %103 = vector.shape_cast %102 : vector<1x8x16xbf16> to vector<8x16xbf16>
      %104 = vector.shape_cast %101 : vector<8x16xbf16> to vector<1x8x16xbf16>
      tpu.vector_store %arg6[%c0_73, %c0_74, %c0_75], %104 {strides = array<i32>} : memref<4x8x16xbf16, #tpu.memory_space<vmem>>, vector<1x8x16xbf16>,
      %c2_76 = arith.constant 2 : index
      %c0_77 = arith.constant 0 : index
      %c0_78 = arith.constant 0 : index
      %c0_79 = arith.constant 0 : index
      %105 = vector.load %arg3[%c2_76, %c0_77, %c0_78, %c0_79] : memref<3x4x32x16xbf16, #tpu.memory_space<vmem>>, vector<1x1x32x16xbf16>
      %106 = vector.shape_cast %105 : vector<1x1x32x16xbf16> to vector<32x16xbf16>
      %cst_80 = arith.constant dense<0.000000e+00> : vector<8x16xf32>
      %107 = tpu.matmul %97, %106, %cst_80 {dimension_numbers = #tpu.dot_dimension_numbers<[1], [0], [0], [1], [0, 0, 1, 1], [], []>} : vector<8x32xbf16>, vector<32x16xbf16>, vector<8x16xf32> -> vector<8x16xf32>
      %108 = arith.truncf %107 : vector<8x16xf32> to vector<8x16xbf16>
      %c0_81 = arith.constant 0 : index
      %c0_82 = arith.constant 0 : index
      %c0_83 = arith.constant 0 : index
      %109 = vector.load %arg7[%c0_81, %c0_82, %c0_83] : memref<4x8x16xbf16, #tpu.memory_space<vmem>>, vector<1x8x16xbf16>
      %110 = vector.shape_cast %109 : vector<1x8x16xbf16> to vector<8x16xbf16>
      %111 = vector.shape_cast %108 : vector<8x16xbf16> to vector<1x8x16xbf16>
      tpu.vector_store %arg7[%c0_81, %c0_82, %c0_83], %111 {strides = array<i32>} : memref<4x8x16xbf16, #tpu.memory_space<vmem>>, vector<1x8x16xbf16>,
      %c1_84 = arith.constant 1 : index
      %c1_85 = arith.constant 1 : index
      %c0_86 = arith.constant 0 : index
      %c0_87 = arith.constant 0 : index
      %112 = vector.load %arg3[%c1_84, %c1_85, %c0_86, %c0_87] : memref<3x4x32x16xbf16, #tpu.memory_space<vmem>>, vector<1x1x32x16xbf16>
      %113 = vector.shape_cast %112 : vector<1x1x32x16xbf16> to vector<32x16xbf16>
      %cst_88 = arith.constant dense<0.000000e+00> : vector<8x16xf32>
      %114 = tpu.matmul %97, %113, %cst_88 {dimension_numbers = #tpu.dot_dimension_numbers<[1], [0], [0], [1], [0, 0, 1, 1], [], []>} : vector<8x32xbf16>, vector<32x16xbf16>, vector<8x16xf32> -> vector<8x16xf32>
      %115 = arith.truncf %114 : vector<8x16xf32> to vector<8x16xbf16>
      %c1_89 = arith.constant 1 : index
      %c0_90 = arith.constant 0 : index
      %c0_91 = arith.constant 0 : index
      %116 = vector.load %arg6[%c1_89, %c0_90, %c0_91] : memref<4x8x16xbf16, #tpu.memory_space<vmem>>, vector<1x8x16xbf16>
      %117 = vector.shape_cast %116 : vector<1x8x16xbf16> to vector<8x16xbf16>
      %118 = vector.shape_cast %115 : vector<8x16xbf16> to vector<1x8x16xbf16>
      tpu.vector_store %arg6[%c1_89, %c0_90, %c0_91], %118 {strides = array<i32>} : memref<4x8x16xbf16, #tpu.memory_space<vmem>>, vector<1x8x16xbf16>,
      %c2_92 = arith.constant 2 : index
      %c1_93 = arith.constant 1 : index
      %c0_94 = arith.constant 0 : index
      %c0_95 = arith.constant 0 : index
      %119 = vector.load %arg3[%c2_92, %c1_93, %c0_94, %c0_95] : memref<3x4x32x16xbf16, #tpu.memory_space<vmem>>, vector<1x1x32x16xbf16>
      %120 = vector.shape_cast %119 : vector<1x1x32x16xbf16> to vector<32x16xbf16>
      %cst_96 = arith.constant dense<0.000000e+00> : vector<8x16xf32>
      %121 = tpu.matmul %97, %120, %cst_96 {dimension_numbers = #tpu.dot_dimension_numbers<[1], [0], [0], [1], [0, 0, 1, 1], [], []>} : vector<8x32xbf16>, vector<32x16xbf16>, vector<8x16xf32> -> vector<8x16xf32>
      %122 = arith.truncf %121 : vector<8x16xf32> to vector<8x16xbf16>
      %c1_97 = arith.constant 1 : index
      %c0_98 = arith.constant 0 : index
      %c0_99 = arith.constant 0 : index
      %123 = vector.load %arg7[%c1_97, %c0_98, %c0_99] : memref<4x8x16xbf16, #tpu.memory_space<vmem>>, vector<1x8x16xbf16>
      %124 = vector.shape_cast %123 : vector<1x8x16xbf16> to vector<8x16xbf16>
      %125 = vector.shape_cast %122 : vector<8x16xbf16> to vector<1x8x16xbf16>
      tpu.vector_store %arg7[%c1_97, %c0_98, %c0_99], %125 {strides = array<i32>} : memref<4x8x16xbf16, #tpu.memory_space<vmem>>, vector<1x8x16xbf16>,
      %c1_100 = arith.constant 1 : index
      %c2_101 = arith.constant 2 : index
      %c0_102 = arith.constant 0 : index
      %c0_103 = arith.constant 0 : index
      %126 = vector.load %arg3[%c1_100, %c2_101, %c0_102, %c0_103] : memref<3x4x32x16xbf16, #tpu.memory_space<vmem>>, vector<1x1x32x16xbf16>
      %127 = vector.shape_cast %126 : vector<1x1x32x16xbf16> to vector<32x16xbf16>
      %cst_104 = arith.constant dense<0.000000e+00> : vector<8x16xf32>
      %128 = tpu.matmul %97, %127, %cst_104 {dimension_numbers = #tpu.dot_dimension_numbers<[1], [0], [0], [1], [0, 0, 1, 1], [], []>} : vector<8x32xbf16>, vector<32x16xbf16>, vector<8x16xf32> -> vector<8x16xf32>
      %129 = arith.truncf %128 : vector<8x16xf32> to vector<8x16xbf16>
      %c2_105 = arith.constant 2 : index
      %c0_106 = arith.constant 0 : index
      %c0_107 = arith.constant 0 : index
      %130 = vector.load %arg6[%c2_105, %c0_106, %c0_107] : memref<4x8x16xbf16, #tpu.memory_space<vmem>>, vector<1x8x16xbf16>
      %131 = vector.shape_cast %130 : vector<1x8x16xbf16> to vector<8x16xbf16>
      %132 = vector.shape_cast %129 : vector<8x16xbf16> to vector<1x8x16xbf16>
      tpu.vector_store %arg6[%c2_105, %c0_106, %c0_107], %132 {strides = array<i32>} : memref<4x8x16xbf16, #tpu.memory_space<vmem>>, vector<1x8x16xbf16>,
      %c2_108 = arith.constant 2 : index
      %c2_109 = arith.constant 2 : index
      %c0_110 = arith.constant 0 : index
      %c0_111 = arith.constant 0 : index
      %133 = vector.load %arg3[%c2_108, %c2_109, %c0_110, %c0_111] : memref<3x4x32x16xbf16, #tpu.memory_space<vmem>>, vector<1x1x32x16xbf16>
      %134 = vector.shape_cast %133 : vector<1x1x32x16xbf16> to vector<32x16xbf16>
      %cst_112 = arith.constant dense<0.000000e+00> : vector<8x16xf32>
      %135 = tpu.matmul %97, %134, %cst_112 {dimension_numbers = #tpu.dot_dimension_numbers<[1], [0], [0], [1], [0, 0, 1, 1], [], []>} : vector<8x32xbf16>, vector<32x16xbf16>, vector<8x16xf32> -> vector<8x16xf32>
      %136 = arith.truncf %135 : vector<8x16xf32> to vector<8x16xbf16>
      %c2_113 = arith.constant 2 : index
      %c0_114 = arith.constant 0 : index
      %c0_115 = arith.constant 0 : index
      %137 = vector.load %arg7[%c2_113, %c0_114, %c0_115] : memref<4x8x16xbf16, #tpu.memory_space<vmem>>, vector<1x8x16xbf16>
      %138 = vector.shape_cast %137 : vector<1x8x16xbf16> to vector<8x16xbf16>
      %139 = vector.shape_cast %136 : vector<8x16xbf16> to vector<1x8x16xbf16>
      tpu.vector_store %arg7[%c2_113, %c0_114, %c0_115], %139 {strides = array<i32>} : memref<4x8x16xbf16, #tpu.memory_space<vmem>>, vector<1x8x16xbf16>,
      %c1_116 = arith.constant 1 : index
      %c3_117 = arith.constant 3 : index
      %c0_118 = arith.constant 0 : index
      %c0_119 = arith.constant 0 : index
      %140 = vector.load %arg3[%c1_116, %c3_117, %c0_118, %c0_119] : memref<3x4x32x16xbf16, #tpu.memory_space<vmem>>, vector<1x1x32x16xbf16>
      %141 = vector.shape_cast %140 : vector<1x1x32x16xbf16> to vector<32x16xbf16>
      %cst_120 = arith.constant dense<0.000000e+00> : vector<8x16xf32>
      %142 = tpu.matmul %97, %141, %cst_120 {dimension_numbers = #tpu.dot_dimension_numbers<[1], [0], [0], [1], [0, 0, 1, 1], [], []>} : vector<8x32xbf16>, vector<32x16xbf16>, vector<8x16xf32> -> vector<8x16xf32>
      %143 = arith.truncf %142 : vector<8x16xf32> to vector<8x16xbf16>
      %c3_121 = arith.constant 3 : index
      %c0_122 = arith.constant 0 : index
      %c0_123 = arith.constant 0 : index
      %144 = vector.load %arg6[%c3_121, %c0_122, %c0_123] : memref<4x8x16xbf16, #tpu.memory_space<vmem>>, vector<1x8x16xbf16>
      %145 = vector.shape_cast %144 : vector<1x8x16xbf16> to vector<8x16xbf16>
      %146 = vector.shape_cast %143 : vector<8x16xbf16> to vector<1x8x16xbf16>
      tpu.vector_store %arg6[%c3_121, %c0_122, %c0_123], %146 {strides = array<i32>} : memref<4x8x16xbf16, #tpu.memory_space<vmem>>, vector<1x8x16xbf16>,
      %c2_124 = arith.constant 2 : index
      %c3_125 = arith.constant 3 : index
      %c0_126 = arith.constant 0 : index
      %c0_127 = arith.constant 0 : index
      %147 = vector.load %arg3[%c2_124, %c3_125, %c0_126, %c0_127] : memref<3x4x32x16xbf16, #tpu.memory_space<vmem>>, vector<1x1x32x16xbf16>
      %148 = vector.shape_cast %147 : vector<1x1x32x16xbf16> to vector<32x16xbf16>
      %cst_128 = arith.constant dense<0.000000e+00> : vector<8x16xf32>
      %149 = tpu.matmul %97, %148, %cst_128 {dimension_numbers = #tpu.dot_dimension_numbers<[1], [0], [0], [1], [0, 0, 1, 1], [], []>} : vector<8x32xbf16>, vector<32x16xbf16>, vector<8x16xf32> -> vector<8x16xf32>
      %150 = arith.truncf %149 : vector<8x16xf32> to vector<8x16xbf16>
      %c3_129 = arith.constant 3 : index
      %c0_130 = arith.constant 0 : index
      %c0_131 = arith.constant 0 : index
      %151 = vector.load %arg7[%c3_129, %c0_130, %c0_131] : memref<4x8x16xbf16, #tpu.memory_space<vmem>>, vector<1x8x16xbf16>
      %152 = vector.shape_cast %151 : vector<1x8x16xbf16> to vector<8x16xbf16>
      %153 = vector.shape_cast %150 : vector<8x16xbf16> to vector<1x8x16xbf16>
      tpu.vector_store %arg7[%c3_129, %c0_130, %c0_131], %153 {strides = array<i32>} : memref<4x8x16xbf16, #tpu.memory_space<vmem>>, vector<1x8x16xbf16>,
    } else {
    }
    %c0 = arith.constant 0 : index
    %c0_1 = arith.constant 0 : index
    %c0_2 = arith.constant 0 : index
    %3 = vector.load %arg2[%c0, %c0_1, %c0_2] : memref<1x8x32xbf16, #tpu.memory_space<vmem>>, vector<1x8x32xbf16>
    %4 = vector.shape_cast %3 : vector<1x8x32xbf16> to vector<8x32xbf16>
    %c0_3 = arith.constant 0 : index
    %c0_4 = arith.constant 0 : index
    %c0_5 = arith.constant 0 : index
    %c0_6 = arith.constant 0 : index
    %5 = vector.load %arg3[%c0_3, %c0_4, %c0_5, %c0_6] : memref<3x4x32x16xbf16, #tpu.memory_space<vmem>>, vector<1x1x32x16xbf16>
    %6 = vector.shape_cast %5 : vector<1x1x32x16xbf16> to vector<32x16xbf16>
    %cst = arith.constant dense<0.000000e+00> : vector<8x16xf32>
    %7 = tpu.matmul %4, %6, %cst {dimension_numbers = #tpu.dot_dimension_numbers<[1], [0], [0], [1], [0, 0, 1, 1], [], []>} : vector<8x32xbf16>, vector<32x16xbf16>, vector<8x16xf32> -> vector<8x16xf32>
    %8 = arith.truncf %7 : vector<8x16xf32> to vector<8x16xbf16>
    %c0_7 = arith.constant 0 : index
    %c0_8 = arith.constant 0 : index
    %c0_9 = arith.constant 0 : index
    %9 = vector.load %arg6[%c0_7, %c0_8, %c0_9] : memref<4x8x16xbf16, #tpu.memory_space<vmem>>, vector<1x8x16xbf16>
    %10 = vector.shape_cast %9 : vector<1x8x16xbf16> to vector<8x16xbf16>
    %c0_10 = arith.constant 0 : index
    %c0_11 = arith.constant 0 : index
    %c0_12 = arith.constant 0 : index
    %11 = vector.load %arg7[%c0_10, %c0_11, %c0_12] : memref<4x8x16xbf16, #tpu.memory_space<vmem>>, vector<1x8x16xbf16>
    %12 = vector.shape_cast %11 : vector<1x8x16xbf16> to vector<8x16xbf16>
    "tpu.trace_start"() <{level = 10 : i32, message = "qd,kd->qk"}> : () -> ()
    %cst_13 = arith.constant dense<0.000000e+00> : vector<8x8xf32>
    %13 = tpu.matmul %8, %10, %cst_13 {dimension_numbers = #tpu.dot_dimension_numbers<[1], [1], [0], [0], [0, 0, 1, 0], [], []>} : vector<8x16xbf16>, vector<8x16xbf16>, vector<8x8xf32> -> vector<8x8xf32>
    "tpu.trace_stop"() : () -> ()
    %cst_14 = arith.constant dense<0xFF800000> : vector<8xf32>
    %14 = vector.multi_reduction <maximumf>, %13, %cst_14 [1] : vector<8x8xf32> to vector<8xf32>
    %15 = vector.shape_cast %14 : vector<8xf32> to vector<8x1xf32>
    %16 = vector.broadcast %15 : vector<8x1xf32> to vector<8x8xf32>
    %17 = arith.subf %13, %16 : vector<8x8xf32>
    %18 = math.exp %17 : vector<8x8xf32>
    %cst_15 = arith.constant dense<0.000000e+00> : vector<8xf32>
    %19 = vector.multi_reduction <add>, %18, %cst_15 [1] : vector<8x8xf32> to vector<8xf32>
    %20 = vector.shape_cast %19 : vector<8xf32> to vector<8x1xf32>
    %21 = tpu.reciprocal %20 {approx = true} : vector<8x1xf32> -> vector<8x1xf32>
    %22 = vector.broadcast %21 : vector<8x1xf32> to vector<8x8xf32>
    %23 = arith.mulf %18, %22 : vector<8x8xf32>
    %24 = arith.truncf %23 : vector<8x8xf32> to vector<8x8xbf16>
    %cst_16 = arith.constant dense<0.000000e+00> : vector<8x16xf32>
    %25 = tpu.matmul %24, %12, %cst_16 {dimension_numbers = #tpu.dot_dimension_numbers<[1], [0], [0], [1], [0, 0, 1, 1], [], []>} : vector<8x8xbf16>, vector<8x16xbf16>, vector<8x16xf32> -> vector<8x16xf32>
    %c0_17 = arith.constant 0 : index
    %c1 = arith.constant 1 : index
    %c0_18 = arith.constant 0 : index
    %c0_19 = arith.constant 0 : index
    %26 = vector.load %arg3[%c0_17, %c1, %c0_18, %c0_19] : memref<3x4x32x16xbf16, #tpu.memory_space<vmem>>, vector<1x1x32x16xbf16>
    %27 = vector.shape_cast %26 : vector<1x1x32x16xbf16> to vector<32x16xbf16>
    %cst_20 = arith.constant dense<0.000000e+00> : vector<8x16xf32>
    %28 = tpu.matmul %4, %27, %cst_20 {dimension_numbers = #tpu.dot_dimension_numbers<[1], [0], [0], [1], [0, 0, 1, 1], [], []>} : vector<8x32xbf16>, vector<32x16xbf16>, vector<8x16xf32> -> vector<8x16xf32>
    %29 = arith.truncf %28 : vector<8x16xf32> to vector<8x16xbf16>
    %c1_21 = arith.constant 1 : index
    %c0_22 = arith.constant 0 : index
    %c0_23 = arith.constant 0 : index
    %30 = vector.load %arg6[%c1_21, %c0_22, %c0_23] : memref<4x8x16xbf16, #tpu.memory_space<vmem>>, vector<1x8x16xbf16>
    %31 = vector.shape_cast %30 : vector<1x8x16xbf16> to vector<8x16xbf16>
    %c1_24 = arith.constant 1 : index
    %c0_25 = arith.constant 0 : index
    %c0_26 = arith.constant 0 : index
    %32 = vector.load %arg7[%c1_24, %c0_25, %c0_26] : memref<4x8x16xbf16, #tpu.memory_space<vmem>>, vector<1x8x16xbf16>
    %33 = vector.shape_cast %32 : vector<1x8x16xbf16> to vector<8x16xbf16>
    "tpu.trace_start"() <{level = 10 : i32, message = "qd,kd->qk"}> : () -> ()
    %cst_27 = arith.constant dense<0.000000e+00> : vector<8x8xf32>
    %34 = tpu.matmul %29, %31, %cst_27 {dimension_numbers = #tpu.dot_dimension_numbers<[1], [1], [0], [0], [0, 0, 1, 0], [], []>} : vector<8x16xbf16>, vector<8x16xbf16>, vector<8x8xf32> -> vector<8x8xf32>
    "tpu.trace_stop"() : () -> ()
    %cst_28 = arith.constant dense<0xFF800000> : vector<8xf32>
    %35 = vector.multi_reduction <maximumf>, %34, %cst_28 [1] : vector<8x8xf32> to vector<8xf32>
    %36 = vector.shape_cast %35 : vector<8xf32> to vector<8x1xf32>
    %37 = vector.broadcast %36 : vector<8x1xf32> to vector<8x8xf32>
    %38 = arith.subf %34, %37 : vector<8x8xf32>
    %39 = math.exp %38 : vector<8x8xf32>
    %cst_29 = arith.constant dense<0.000000e+00> : vector<8xf32>
    %40 = vector.multi_reduction <add>, %39, %cst_29 [1] : vector<8x8xf32> to vector<8xf32>
    %41 = vector.shape_cast %40 : vector<8xf32> to vector<8x1xf32>
    %42 = tpu.reciprocal %41 {approx = true} : vector<8x1xf32> -> vector<8x1xf32>
    %43 = vector.broadcast %42 : vector<8x1xf32> to vector<8x8xf32>
    %44 = arith.mulf %39, %43 : vector<8x8xf32>
    %45 = arith.truncf %44 : vector<8x8xf32> to vector<8x8xbf16>
    %cst_30 = arith.constant dense<0.000000e+00> : vector<8x16xf32>
    %46 = tpu.matmul %45, %33, %cst_30 {dimension_numbers = #tpu.dot_dimension_numbers<[1], [0], [0], [1], [0, 0, 1, 1], [], []>} : vector<8x8xbf16>, vector<8x16xbf16>, vector<8x16xf32> -> vector<8x16xf32>
    %c0_31 = arith.constant 0 : index
    %c2 = arith.constant 2 : index
    %c0_32 = arith.constant 0 : index
    %c0_33 = arith.constant 0 : index
    %47 = vector.load %arg3[%c0_31, %c2, %c0_32, %c0_33] : memref<3x4x32x16xbf16, #tpu.memory_space<vmem>>, vector<1x1x32x16xbf16>
    %48 = vector.shape_cast %47 : vector<1x1x32x16xbf16> to vector<32x16xbf16>
    %cst_34 = arith.constant dense<0.000000e+00> : vector<8x16xf32>
    %49 = tpu.matmul %4, %48, %cst_34 {dimension_numbers = #tpu.dot_dimension_numbers<[1], [0], [0], [1], [0, 0, 1, 1], [], []>} : vector<8x32xbf16>, vector<32x16xbf16>, vector<8x16xf32> -> vector<8x16xf32>
    %50 = arith.truncf %49 : vector<8x16xf32> to vector<8x16xbf16>
    %c2_35 = arith.constant 2 : index
    %c0_36 = arith.constant 0 : index
    %c0_37 = arith.constant 0 : index
    %51 = vector.load %arg6[%c2_35, %c0_36, %c0_37] : memref<4x8x16xbf16, #tpu.memory_space<vmem>>, vector<1x8x16xbf16>
    %52 = vector.shape_cast %51 : vector<1x8x16xbf16> to vector<8x16xbf16>
    %c2_38 = arith.constant 2 : index
    %c0_39 = arith.constant 0 : index
    %c0_40 = arith.constant 0 : index
    %53 = vector.load %arg7[%c2_38, %c0_39, %c0_40] : memref<4x8x16xbf16, #tpu.memory_space<vmem>>, vector<1x8x16xbf16>
    %54 = vector.shape_cast %53 : vector<1x8x16xbf16> to vector<8x16xbf16>
    "tpu.trace_start"() <{level = 10 : i32, message = "qd,kd->qk"}> : () -> ()
    %cst_41 = arith.constant dense<0.000000e+00> : vector<8x8xf32>
    %55 = tpu.matmul %50, %52, %cst_41 {dimension_numbers = #tpu.dot_dimension_numbers<[1], [1], [0], [0], [0, 0, 1, 0], [], []>} : vector<8x16xbf16>, vector<8x16xbf16>, vector<8x8xf32> -> vector<8x8xf32>
    "tpu.trace_stop"() : () -> ()
    %cst_42 = arith.constant dense<0xFF800000> : vector<8xf32>
    %56 = vector.multi_reduction <maximumf>, %55, %cst_42 [1] : vector<8x8xf32> to vector<8xf32>
    %57 = vector.shape_cast %56 : vector<8xf32> to vector<8x1xf32>
    %58 = vector.broadcast %57 : vector<8x1xf32> to vector<8x8xf32>
    %59 = arith.subf %55, %58 : vector<8x8xf32>
    %60 = math.exp %59 : vector<8x8xf32>
    %cst_43 = arith.constant dense<0.000000e+00> : vector<8xf32>
    %61 = vector.multi_reduction <add>, %60, %cst_43 [1] : vector<8x8xf32> to vector<8xf32>
    %62 = vector.shape_cast %61 : vector<8xf32> to vector<8x1xf32>
    %63 = tpu.reciprocal %62 {approx = true} : vector<8x1xf32> -> vector<8x1xf32>
    %64 = vector.broadcast %63 : vector<8x1xf32> to vector<8x8xf32>
    %65 = arith.mulf %60, %64 : vector<8x8xf32>
    %66 = arith.truncf %65 : vector<8x8xf32> to vector<8x8xbf16>
    %cst_44 = arith.constant dense<0.000000e+00> : vector<8x16xf32>
    %67 = tpu.matmul %66, %54, %cst_44 {dimension_numbers = #tpu.dot_dimension_numbers<[1], [0], [0], [1], [0, 0, 1, 1], [], []>} : vector<8x8xbf16>, vector<8x16xbf16>, vector<8x16xf32> -> vector<8x16xf32>
    %c0_45 = arith.constant 0 : index
    %c3 = arith.constant 3 : index
    %c0_46 = arith.constant 0 : index
    %c0_47 = arith.constant 0 : index
    %68 = vector.load %arg3[%c0_45, %c3, %c0_46, %c0_47] : memref<3x4x32x16xbf16, #tpu.memory_space<vmem>>, vector<1x1x32x16xbf16>
    %69 = vector.shape_cast %68 : vector<1x1x32x16xbf16> to vector<32x16xbf16>
    %cst_48 = arith.constant dense<0.000000e+00> : vector<8x16xf32>
    %70 = tpu.matmul %4, %69, %cst_48 {dimension_numbers = #tpu.dot_dimension_numbers<[1], [0], [0], [1], [0, 0, 1, 1], [], []>} : vector<8x32xbf16>, vector<32x16xbf16>, vector<8x16xf32> -> vector<8x16xf32>
    %71 = arith.truncf %70 : vector<8x16xf32> to vector<8x16xbf16>
    %c3_49 = arith.constant 3 : index
    %c0_50 = arith.constant 0 : index
    %c0_51 = arith.constant 0 : index
    %72 = vector.load %arg6[%c3_49, %c0_50, %c0_51] : memref<4x8x16xbf16, #tpu.memory_space<vmem>>, vector<1x8x16xbf16>
    %73 = vector.shape_cast %72 : vector<1x8x16xbf16> to vector<8x16xbf16>
    %c3_52 = arith.constant 3 : index
    %c0_53 = arith.constant 0 : index
    %c0_54 = arith.constant 0 : index
    %74 = vector.load %arg7[%c3_52, %c0_53, %c0_54] : memref<4x8x16xbf16, #tpu.memory_space<vmem>>, vector<1x8x16xbf16>
    %75 = vector.shape_cast %74 : vector<1x8x16xbf16> to vector<8x16xbf16>
    "tpu.trace_start"() <{level = 10 : i32, message = "qd,kd->qk"}> : () -> ()
    %cst_55 = arith.constant dense<0.000000e+00> : vector<8x8xf32>
    %76 = tpu.matmul %71, %73, %cst_55 {dimension_numbers = #tpu.dot_dimension_numbers<[1], [1], [0], [0], [0, 0, 1, 0], [], []>} : vector<8x16xbf16>, vector<8x16xbf16>, vector<8x8xf32> -> vector<8x8xf32>
    "tpu.trace_stop"() : () -> ()
    %cst_56 = arith.constant dense<0xFF800000> : vector<8xf32>
    %77 = vector.multi_reduction <maximumf>, %76, %cst_56 [1] : vector<8x8xf32> to vector<8xf32>
    %78 = vector.shape_cast %77 : vector<8xf32> to vector<8x1xf32>
    %79 = vector.broadcast %78 : vector<8x1xf32> to vector<8x8xf32>
    %80 = arith.subf %76, %79 : vector<8x8xf32>
    %81 = math.exp %80 : vector<8x8xf32>
    %cst_57 = arith.constant dense<0.000000e+00> : vector<8xf32>
    %82 = vector.multi_reduction <add>, %81, %cst_57 [1] : vector<8x8xf32> to vector<8xf32>
    %83 = vector.shape_cast %82 : vector<8xf32> to vector<8x1xf32>
    %84 = tpu.reciprocal %83 {approx = true} : vector<8x1xf32> -> vector<8x1xf32>
    %85 = vector.broadcast %84 : vector<8x1xf32> to vector<8x8xf32>
    %86 = arith.mulf %81, %85 : vector<8x8xf32>
    %87 = arith.truncf %86 : vector<8x8xf32> to vector<8x8xbf16>
    %cst_58 = arith.constant dense<0.000000e+00> : vector<8x16xf32>
    %88 = tpu.matmul %87, %75, %cst_58 {dimension_numbers = #tpu.dot_dimension_numbers<[1], [0], [0], [1], [0, 0, 1, 1], [], []>} : vector<8x8xbf16>, vector<8x16xbf16>, vector<8x16xf32> -> vector<8x16xf32>
    %89 = tpu.concatenate %25, %46, %67, %88 in 1 : vector<8x16xf32>, vector<8x16xf32>, vector<8x16xf32>, vector<8x16xf32> -> vector<8x64xf32>
    %90 = arith.truncf %89 : vector<8x64xf32> to vector<8x64xbf16>
    %c0_59 = arith.constant 0 : index
    %c0_60 = arith.constant 0 : index
    %91 = vector.load %arg4[%c0_59, %c0_60] : memref<64x32xbf16, #tpu.memory_space<vmem>>, vector<64x32xbf16>
    %cst_61 = arith.constant dense<0.000000e+00> : vector<8x32xf32>
    %92 = tpu.matmul %90, %91, %cst_61 {dimension_numbers = #tpu.dot_dimension_numbers<[1], [0], [0], [1], [0, 0, 1, 1], [], []>} : vector<8x64xbf16>, vector<64x32xbf16>, vector<8x32xf32> -> vector<8x32xf32>
    %c0_62 = arith.constant 0 : index
    %c0_63 = arith.constant 0 : index
    %c0_64 = arith.constant 0 : index
    %93 = vector.load %arg5[%c0_62, %c0_63, %c0_64] : memref<1x8x32xf32, #tpu.memory_space<vmem>>, vector<1x8x32xf32>
    %94 = vector.shape_cast %93 : vector<1x8x32xf32> to vector<8x32xf32>
    %95 = vector.shape_cast %92 : vector<8x32xf32> to vector<1x8x32xf32>
    tpu.vector_store %arg5[%c0_62, %c0_63, %c0_64], %95 {strides = array<i32>} : memref<1x8x32xf32, #tpu.memory_space<vmem>>, vector<1x8x32xf32>,
    return
  }
  func.func @transform_0(%arg0: i32, %arg1: i32) -> (i32, i32, i32) {
    %c0_i32 = arith.constant 0 : i32
    %c0_i32_0 = arith.constant 0 : i32
    %c0_i32_1 = arith.constant 0 : i32
    return %arg0, %c0_i32, %c0_i32_0 : i32, i32, i32
  }
  func.func @transform_1(%arg0: i32, %arg1: i32) -> (i32, i32, i32, i32) {
    %c0_i32 = arith.constant 0 : i32
    %c0_i32_0 = arith.constant 0 : i32
    %c0_i32_1 = arith.constant 0 : i32
    %c0_i32_2 = arith.constant 0 : i32
    %c0_i32_3 = arith.constant 0 : i32
    return %c0_i32, %c0_i32_0, %c0_i32_1, %c0_i32_2 : i32, i32, i32, i32
  }
  func.func @transform_2(%arg0: i32, %arg1: i32) -> (i32, i32) {
    %c0_i32 = arith.constant 0 : i32
    %c0_i32_0 = arith.constant 0 : i32
    %c0_i32_1 = arith.constant 0 : i32
    return %c0_i32, %c0_i32_0 : i32, i32
  }
  func.func @transform_3(%arg0: i32, %arg1: i32) -> (i32, i32, i32) {
    %c0_i32 = arith.constant 0 : i32
    %c0_i32_0 = arith.constant 0 : i32
    return %arg0, %arg1, %c0_i32 : i32, i32, i32
  }
}

</mosaic_0001>

<bundles_post_ra>
// kernel: tpu_custom_call.1
= control target key start
LH: loop header
LB: loop body
LE: loop exit
PB: predicated region body
PF: predicated region fallthrough
CT: control target
= control target key end

     0   :  { %8 = vsyncpa [#allocation5], 0  ;;  %s2373_s0 = inlined_call_operand.vmem [shape: bf16[2,8,32], index: 0, kind: input, shape index: {}]   ;;  %s2374_s1 = inlined_call_operand.vmem [shape: bf16[3,4,32,16], index: 1, kind: input, shape index: {}]   ;;  %s2375_s2 = inlined_call_operand.vmem [shape: bf16[64,32], index: 2, kind: input, shape index: {}]   ;;  %s2376_s3 = inlined_call_operand.hbm [shape: f32[2,8,32], index: 3, kind: output, shape index: {}]  }
   0x1   :  { %10 = vsyncpa [#allocation5 + $0x1], 0  ;;  %s2040_s12 = smov 0   ;;  %s2042_s13 = smov 0  }
   0x2   :  { %s2044_s14 = smov 0   ;;  %s2046_s15 = smov 0  }
   0x3   :  { %s2048_s16 = smov 0   ;;  %s2050_s17 = smov 0  }
   0x4 LB: > { %s1515_s18 = sadd.s32 4294967295, %s2012_s17   ;;  %s1516_s19 = sadd.s32 4294967294, %s2012_s17   ;;  %s2012_s17 = sphi %s2050_s17, %s16_s17   ;;  %s2008_s16 = sphi %s2048_s16, %s2383_s16   ;;  %s2004_s15 = sphi %s2046_s15, %s2382_s15   ;;  %s2000_s14 = sphi %s2044_s14, %s2381_s14   ;;  %s1996_s13 = sphi %s2042_s13, %s2380_s13   ;;  %s1992_s12 = sphi %s2040_s12, %s2379_s12  }
   0x5   : > { %s28_s20 = sadd.s32 1, %s2008_s16  ;;  %s105_s21 = sadd.s32 1, %s2000_s14 }
   0x6   : > { %p30_p0 = scmp.ge.s32.totalorder %s28_s20, 2  ;;  %p115_p1 = scmp.ne.s32.totalorder %s2000_s14, %s1996_s13 }
   0x7   : > { %p116_p2 = scmp.eq.s32.totalorder %s1515_s18, 1  ;;  %p121_p3 = scmp.ne.s32.totalorder %s1996_s13, %s1992_s12 }
   0x8   : > { %s2385_s20 = smov (%p30_p0, %s28_s20), 0  ;;  %p122_p5 = scmp.eq.s32.totalorder %s1516_s19, 1 }
   0x9   : > { %p2080_p4 = por %p116_p2, %p115_p1  ;;  %s100_s23 = ssub.s32 %s2008_s16, %s2385_s20 }
   0xa   : > { %p1519_p6 = scmp.ge.s32.totalorder %s2012_s17, 1  ;;  %p103_p7 = scmp.eq.s32.totalorder %s100_s23, 0 }
   0xb   : > { %p2087_p8 = por %p122_p5, %p121_p3  ;;  %p153_p9 = scmp.lt.s32.totalorder %s2012_s17, 3 }
   0xc   : > { %s2093_s25 = scalar_select %p103_p7, %s2000_s14, %s105_s21  }
   0xd   : > { %p154_p10 = pnand %p1519_p6, %p153_p9 }
   0xe   : > { %p176_p11 = scmp.lt.s32.totalorder (!%p154_p10), %s2004_s15, 1  ;;  %s2016_s29 = smov (!%p154_p10), 16  }
   0xf   : > { %157 = sbr.rel (%p154_p10) target bundleno = 2820 (0xb04), region = 32  ;;  %s2017_s30 = smov (!%p154_p10), 32  }
  0x10   : > { %s2018_s11 = smov (!%p154_p10), 48   ;;  %s173_s18 = sand.u32 (!%p154_p10), 1, %s1996_s13  }
  0x11   : > { %s1520_s21 = sshll.u32 (!%p154_p10), %s173_s18, 3  ;;  %s1616_s23 = sshll.u32 (!%p154_p10), %s2004_s15, 7 }
  0x12   : > { %s175_s26 = scalar_lea.vmem (!%p154_p10), [#allocation4], %s1520_s21 }
  0x13   : > { %s1447_s27 = sshll.u32 (!%p154_p10), %s175_s26, 4  ;;  %s2328_s27 = int_to_ptr.vmem [resolvable:$true] %s1447_s27 }
  0x14   : > { %v1892_v0 = vld [vmem:[%s2374_s1 + $0x58] sm:$0xff]   ;;  %v2014_v1 = vmov 0.0   ;;  %v1893_v2 = vld [vmem:[%s2374_s1 + $0x48] sm:$0xff]   ;;  %v1894_v3 = vld [vmem:[%s2374_s1 + $0x50] sm:$0xff]   ;;  %vm2015_vm0 = vmmov 0   ;;  %s177_s7 = scalar_select %p176_p11, %s2004_s15, 1 }
  0x15   : > { %1692 = vmatprep.subr.bf16.mxu0 %v2014_v1  ;;  %1676 = vmatprep.subr.bf16.mxu1 %v2014_v1  ;;  %v1895_v4 = vld [vmem:[%s2374_s1 + $0x40] sm:$0xff]   ;;  %vm203_vm1 = vcmask 261120   ;;  %v1896_v5 = vld [vmem:[%s2374_s1 + $0x68] sm:$0xff]   ;;  %v1898_v10 = vld [vmem:[%s2374_s1 + $0x78] sm:$0xff]   ;;  %vm248_vm2 = vcmask 125952   ;;  %vm733_vm3 = vcmask 130048  }
  0x16   : > { %1693 = vmatpush3.bf16.msra.mxu0 %v1892_v0  ;;  %1696 = vmatprep.mubr.msk.bf16.mxu0 %vm2015_vm0, %v2014_v1  ;;  %s1521_s8 = sshll.u32 %s177_s7, 2  ;;  %v1897_v7 = vld [vmem:[%s2374_s1 + $0x60] sm:$0xff]   ;;  %v1902_v8 = vld [vmem:[%s2374_s1 + $0x88] sm:$0xff]   ;;  %v1904_v11 = vld [vmem:[%s2374_s1 + $0x98] sm:$0xff]   ;;  %vm796_vm4 = vcmask 1043456   ;;  %vm780_vm5 = vcmask 64512  }
  0x17   : > { %1677 = vmatpush3.bf16.msra.mxu1 %v1893_v2  ;;  %1694 = vmatprep.subr.bf16.mxu0 %v2014_v1  ;;  %s2123_s19 = scalar_lea.vmem %s2373_s0, %s1521_s8  ;;  %v1903_v9 = vld [vmem:[%s2374_s1 + $0x80] sm:$0xff]   ;;  %v1899_v12 = vld [vmem:[%s2374_s1 + $0x70] sm:$0xff]   ;;  %v1900_v14 = vld [vmem:[%s2374_s1 + $0x8] sm:$0xff]   ;;  %vm1352_vm6 = vcmask 392192   ;;  %vm1387_vm7 = vcmask 523264   ;;  %s1936_s4 = scalar_lea.vmem %s2328_s27, 128 }
  0x18   : > { %1678 = vmatprep.subr.bf16.mxu1 %v2014_v1  ;;  %1680 = vmatprep.mubr.msk.bf16.mxu1 %vm2015_vm0, %v2014_v1  ;;  %v185_v6 = vld [vmem:[%s2123_s19] sm:$0xf]  ;;  %v1905_v13 = vld [vmem:[%s2374_s1 + $0x90] sm:$0xff]   ;;  %v1906_v15 = vld [vmem:[%s2374_s1 + $0xa8] sm:$0xff]   ;;  %p1937_p12 = scmp.ne.s32.totalorder %s2328_s27, %s1936_s4  ;;  %s2019_s15 = smov [#allocation4]  }
  0x19   : > { %v1901_v16 = vld [vmem:[%s2374_s1] sm:$0xff]   ;;  %v1908_v19 = vld [vmem:[%s2374_s1 + $0xb8] sm:$0xff]   ;;  %v1909_v20 = vld [vmem:[%s2374_s1 + $0xb0] sm:$0xff]   ;;  %s1940_s5 = sshll.u32 %s2019_s15, 4  ;;  %s1941_s5 = int_to_ptr.vmem [resolvable:$false] %s1940_s5 }
  0x1a   : > { %1695 = vmatpush3.bf16.msra.mxu0 %v1894_v3  ;;  %v2186_v17 = vld [vmem:[%s2123_s19] sm:$0xf]  ;;  %v1910_v55 = vld [vmem:[%s2374_s1 + $0x18] sm:$0xff]   ;;  %v1911_v60 = vld [vmem:[%s2374_s1 + $0x10] sm:$0xff]   ;;  %s1433_s19 = scalar_lea.sflag [#allocation5], %s173_s18  ;;  %p1938_p13 = pnand %p1937_p12, %p2080_p4 }
  0x1b   : > { %1679 = vmatpush3.bf16.msra.mxu1 %v1895_v4  ;;  %1708 = vmatprep.subr.bf16.mxu0 %v2014_v1  ;;  %v1907_v18 = vld [vmem:[%s2374_s1 + $0xa0] sm:$0xff]   ;;  %s1942_s6 = scalar_lea.vmem %s1941_s5, 256  ;;  %p1943_p1 = scmp.lt.s32.totalorder %s2328_s27, %s1941_s5 }
  0x1c   : > { %1684 = vmatprep.subr.bf16.mxu1 %v2014_v1  ;;  %p1939_p0 = pneg %p1938_p13  ;;  %p1944_p2 = scmp.lt.s32.totalorder %s1942_s6, %s1936_s4 }
  0x1d   : > { %1697 = vmatmul.mubr.msk.bf16.vlgmr.msra.gmra.mxu0 %vm203_vm1, %v185_v6 }
  0x1e   : > { %1709 = vmatpush3.bf16.msra.mxu0 %v1896_v5  ;;  %1681 = vmatmul.mubr.msk.bf16.vlgmr.msra.gmra.mxu1 %vm203_vm1, %v185_v6  ;;  %p1945_p3 = por %p1944_p2, %p1943_p1 }
  0x1f   : > { %1710 = vmatprep.subr.bf16.mxu0 %v2014_v1  ;;  %1712 = vmatprep.mubr.msk.bf16.mxu0 %vm2015_vm0, %v2014_v1 }
  0x20   : > { %1688 = vmatprep.mubr.msk.bf16.mxu1 %vm2015_vm0, %v2014_v1  ;;  %1685 = vmatpush3.bf16.msra.mxu1 %v1902_v8  ;;  %p1946_p5 = pnand %p1945_p3, %p1939_p0 }
  0x21   : > { %1686 = vmatprep.subr.bf16.mxu1 %v2014_v1 }
  0x22   : > { %1711 = vmatpush3.bf16.msra.mxu0 %v1897_v7 }
  0x23   : > { %1724 = vmatprep.subr.bf16.mxu0 %v2014_v1 }
  0x24   : > { %1687 = vmatpush3.bf16.msra.mxu1 %v1903_v9 }
  0x25   : > { %1713 = vmatmul.mubr.msk.bf16.vlgmr.msra.gmra.mxu0 %vm203_vm1, %v185_v6  ;;  %1700 = vmatprep.subr.bf16.mxu1 %v2014_v1 }
  0x26   : > { %1725 = vmatpush3.bf16.msra.mxu0 %v1898_v10  ;;  %1728 = vmatprep.mubr.msk.bf16.mxu0 %vm2015_vm0, %v2014_v1 }
  0x27   : > { %1726 = vmatprep.subr.bf16.mxu0 %v2014_v1  ;;  %1689 = vmatmul.mubr.msk.bf16.vlgmr.msra.gmra.mxu1 %vm203_vm1, %v185_v6 }
  0x28   : > { %1701 = vmatpush3.bf16.msra.mxu1 %v1904_v11  ;;  %1704 = vmatprep.mubr.msk.bf16.mxu1 %vm2015_vm0, %v2014_v1 }
  0x29   : > { %1702 = vmatprep.subr.bf16.mxu1 %v2014_v1 }
  0x2a   : > { %1727 = vmatpush3.bf16.msra.mxu0 %v1899_v12 }
  0x2b   : > { %1740 = vmatprep.subr.bf16.mxu0 %v2014_v1 }
  0x2c   : > { %1703 = vmatpush3.bf16.msra.mxu1 %v1905_v13 }
  0x2d   : > { %1729 = vmatmul.mubr.msk.bf16.vlgmr.msra.gmra.mxu0 %vm203_vm1, %v185_v6  ;;  %1716 = vmatprep.subr.bf16.mxu1 %v2014_v1 }
  0x2e   : > { %1741 = vmatpush3.bf16.msra.mxu0 %v1900_v14  ;;  %1744 = vmatprep.mubr.msk.bf16.mxu0 %vm2015_vm0, %v2014_v1 }
  0x2f   : > { %1742 = vmatprep.subr.bf16.mxu0 %v2014_v1  ;;  %1705 = vmatmul.mubr.msk.bf16.vlgmr.msra.gmra.mxu1 %vm203_vm1, %v185_v6 }
  0x30   : > { %1717 = vmatpush3.bf16.msra.mxu1 %v1906_v15  ;;  %1720 = vmatprep.mubr.msk.bf16.mxu1 %vm2015_vm0, %v2014_v1 }
  0x31   : > { %1718 = vmatprep.subr.bf16.mxu1 %v2014_v1 }
  0x32   : > { %1743 = vmatpush3.bf16.msra.mxu0 %v1901_v16 }
  0x33   : > { %1754 = vmatprep.subr.bf16.mxu0 %v2014_v1 }
  0x34   : > { %1719 = vmatpush3.bf16.msra.mxu1 %v1907_v18 }
  0x35   : > { %1745 = vmatmul.mubr.msk.bf16.vlgmr.msra.gmra.mxu0 %vm203_vm1, %v2186_v17  ;;  %1732 = vmatprep.subr.bf16.mxu1 %v2014_v1 }
  0x36   : > { %1756 = vmatprep.mubr.msk.bf16.mxu0 %vm2015_vm0, %v2014_v1 }
  0x37   : > { %1721 = vmatmul.mubr.msk.bf16.vlgmr.msra.gmra.mxu1 %vm203_vm1, %v185_v6 }
  0x38   : > { %1733 = vmatpush3.bf16.msra.mxu1 %v1908_v19  ;;  %1736 = vmatprep.mubr.msk.bf16.mxu1 %vm2015_vm0, %v2014_v1 }
  0x39   : > { %1734 = vmatprep.subr.bf16.mxu1 %v2014_v1 }
  0x3c   : > { %1735 = vmatpush3.bf16.msra.mxu1 %v1909_v20 }
  0x3d   : > { %1748 = vmatprep.subr.bf16.mxu1 %v2014_v1 }
  0x3f   : > { %1737 = vmatmul.mubr.msk.bf16.vlgmr.msra.gmra.mxu1 %vm203_vm1, %v185_v6 }
  0x40   : > { %1750 = vmatprep.mubr.msk.bf16.mxu1 %vm2015_vm0, %v2014_v1 }
  0xdd   : > { %v360_v21 = vpop.f32.mrf.mxu0 }
  0xde   : > { %v366_v22 = vpack.c.bf16 %v360_v21, %v360_v21  ;;  %v241_v23 = vpop.f32.mrf.mxu1 }
  0xdf   : > { %v247_v24 = vpack.c.bf16 %v241_v23, %v241_v23  ;;  %v1698_v25 = vpop.f32.mrf.mxu0 }
  0xe0   : > { %368 = vst.msk [vmem:[#allocation2 + $0x4] sm:$0xf] %vm248_vm2, %v366_v22  ;;  %v1682_v26 = vpop.f32.mrf.mxu1 }
  0xe1   : > { %249 = vst.msk [vmem:[#allocation2] sm:$0xf] %vm248_vm2, %v247_v24  ;;  %v363_v27 = vpop.f32.mrf.mxu0 }
  0xe2   : > { %v244_v28 = vpop.f32.mrf.mxu1 }
  0xe3   : > { %v1699_v29 = vpop.f32.mrf.mxu0 }
  0xe4   : > { %v1683_v30 = vpop.f32.mrf.mxu1 }
  0xe5   : > { %v480_v31 = vpop.f32.mrf.mxu0 }
  0xe6   : > { %v486_v32 = vpack.c.bf16 %v480_v31, %v480_v31 }
  0xe7   : > { %v1714_v33 = vpop.f32.mrf.mxu0  ;;  %v301_v35 = vpop.f32.mrf.mxu1  ;;  %v899_v29 = vld [vmem:[#allocation2 + $0x4] sm:$0xf] }
  0xe8   : > { %488 = vst.msk [vmem:[#allocation2 + $0x8] sm:$0xf] %vm248_vm2, %v486_v32  ;;  %v731_v34 = vld [vmem:[#allocation2] sm:$0xf]  ;;  %v307_v38 = vpack.c.bf16 %v301_v35, %v301_v35  ;;  %v906_v31 = vsel %vm733_vm3, %v899_v29, 0  ;;  %v1912_v33 = vld [vmem:[%s2374_s1 + $0x28] sm:$0xff]  }
  0xe9   : > { %v483_v36 = vpop.f32.mrf.mxu0  ;;  %v738_v37 = vsel %vm733_vm3, %v731_v34, 0  ;;  %v1690_v39 = vpop.f32.mrf.mxu1  ;;  %v1913_v34 = vld [vmem:[%s2374_s1 + $0x20] sm:$0xff]  }
  0xea   : > { %1749 = vmatpush3.bf16.xpose.msra.mxu1 %v738_v37  ;;  %308 = vst.msk [vmem:[#allocation3] sm:$0xf] %vm248_vm2, %v307_v38 }
  0xeb   : > { %v1715_v40 = vpop.f32.mrf.mxu0  ;;  %1760 = vmatprep.subr.bf16.mxu1 %v2014_v1  ;;  %v304_v41 = vpop.f32.mrf.mxu1 }
  0xed   : > { %v600_v42 = vpop.f32.mrf.mxu0  ;;  %v1691_v44 = vpop.f32.mrf.mxu1 }
  0xee   : > { %v606_v43 = vpack.c.bf16 %v600_v42, %v600_v42 }
  0xef   : > { %v1730_v45 = vpop.f32.mrf.mxu0  ;;  %v420_v46 = vpop.f32.mrf.mxu1 }
  0xf0   : > { %608 = vst.msk [vmem:[#allocation2 + $0xc] sm:$0xf] %vm248_vm2, %v606_v43  ;;  %v426_v48 = vpack.c.bf16 %v420_v46, %v420_v46 }
  0xf1   : > { %v603_v47 = vpop.f32.mrf.mxu0  ;;  %v1706_v49 = vpop.f32.mrf.mxu1  ;;  %v732_v50 = vld [vmem:[#allocation3] sm:$0xf] }
  0xf2   : > { %428 = vst.msk [vmem:[#allocation3 + $0x4] sm:$0xf] %vm248_vm2, %v426_v48  ;;  %v798_v52 = vsel %vm796_vm4, %v732_v50, 0 }
  0xf3   : > { %v1731_v51 = vpop.f32.mrf.mxu0  ;;  %v423_v53 = vpop.f32.mrf.mxu1  ;;  %1755 = vmatpush3.bf16.msra.mxu0 %v798_v52 }
  0xf4   : > { %1768 = vmatprep.subr.bf16.mxu0 %v2014_v1 }
  0xf5   : > { %v724_v54 = vpop.f32.mrf.mxu0  ;;  %v1707_v57 = vpop.f32.mrf.mxu1 }
  0xf6   : > { %v730_v56 = vpack.c.bf16 %v724_v54, %v724_v54 }
  0xf7   : > { %v1746_v58 = vpop.f32.mrf.mxu0  ;;  %v540_v0 = vpop.f32.mrf.mxu1 }
  0xf8   : > { %1751 = vmatmul.mubr.msk.bf16.vlgmr.msra.gmra.mxu1 %vm733_vm3, %v730_v56  ;;  %v546_v2 = vpack.c.bf16 %v540_v0, %v540_v0  ;;  %v1065_v58 = vld [vmem:[#allocation2 + $0x8] sm:$0xf] }
  0xf9   : > { %v727_v59 = vpop.f32.mrf.mxu0  ;;  %1761 = vmatpush3.bf16.msra.mxu1 %v1910_v55  ;;  %1764 = vmatprep.mubr.msk.bf16.mxu1 %vm2015_vm0, %v2014_v1  ;;  %v901_v62 = vld [vmem:[#allocation3 + $0x4] sm:$0xf]  ;;  %v1722_v3 = vpop.f32.mrf.mxu1 }
  0xfa   : > { %1762 = vmatprep.subr.bf16.mxu1 %v2014_v1  ;;  %v964_v63 = vsel %vm796_vm4, %v901_v62, 0  ;;  %548 = vst.msk [vmem:[#allocation3 + $0x8] sm:$0xf] %vm248_vm2, %v546_v2  ;;  %v1914_v62 = vld [vmem:[%s2374_s1 + $0x38] sm:$0xff]  }
  0xfb   : > { %v1747_v61 = vpop.f32.mrf.mxu0  ;;  %v543_v4 = vpop.f32.mrf.mxu1 }
  0xfd   : > { %1763 = vmatpush3.bf16.msra.mxu1 %v1911_v60  ;;  %v1723_v5 = vpop.f32.mrf.mxu1  ;;  %v1072_v60 = vsel %vm733_vm3, %v1065_v58, 0 }
  0xfe   : > { %1774 = vmatprep.subr.bf16.mxu1 %v2014_v1 }
  0xff   : > { %v660_v6 = vpop.f32.mrf.mxu1 }
 0x100   : > { %1765 = vmatmul.mubr.msk.bf16.vlgmr.msra.gmra.mxu1 %vm203_vm1, %v2186_v17  ;;  %v666_v7 = vpack.c.bf16 %v660_v6, %v660_v6 }
 0x101   : > { %1775 = vmatpush3.bf16.msra.mxu1 %v964_v63  ;;  %1776 = vmatprep.mubr.msk.bf16.mxu1 %vm2015_vm0, %v2014_v1  ;;  %v1738_v8 = vpop.f32.mrf.mxu1  ;;  %v1067_v35 = vld [vmem:[#allocation3 + $0x8] sm:$0xf]  ;;  %v1915_v63 = vld [vmem:[%s2374_s1 + $0x30] sm:$0xff]  }
 0x102   : > { %1788 = vmatprep.subr.bf16.mxu1 %v2014_v1  ;;  %668 = vst.msk [vmem:[#allocation3 + $0xc] sm:$0xf] %vm248_vm2, %v666_v7  ;;  %v1130_v36 = vsel %vm796_vm4, %v1067_v35, 0 }
 0x103   : > { %v663_v9 = vpop.f32.mrf.mxu1 }
 0x105   : > { %v1739_v10 = vpop.f32.mrf.mxu1 }
 0x109   : > { %v1233_v0 = vld [vmem:[#allocation3 + $0xc] sm:$0xf] }
 0x10a   : > { %v1296_v2 = vsel %vm796_vm4, %v1233_v0, 0 }
 0x1b8   : > { %v774_v11 = vpop.f32.mrf.mxu1 }
 0x1b9   : > { %v781_v12 = vsel %vm780_vm5, %v774_v11, -inf }
 0x1ba   : > { %782 = vmax.xlane.f32.xlu0 %v781_v12  ;;  %v1752_v13 = vpop.f32.mrf.mxu1 }
 0x1bc   : > { %v777_v14 = vpop.f32.mrf.mxu1 }
 0x1be   : > { %v1753_v15 = vpop.f32.mrf.mxu1 }
 0x1c0   : > { %v891_v22 = vpop.f32.mrf.mxu1 }
 0x1c1   : > { %v897_v32 = vpack.c.bf16 %v891_v22, %v891_v22 }
 0x1c2   : > { %v1766_v23 = vpop.f32.mrf.mxu1 }
 0x1c4   : > { %v894_v24 = vpop.f32.mrf.mxu1 }
 0x1c5   : > { %v1231_v24 = vld [vmem:[#allocation2 + $0xc] sm:$0xf] }
 0x1c6   : > { %v1767_v25 = vpop.f32.mrf.mxu1 }
 0x243   : > { %v783_v16 = vpop.xlane.xlu0 %782 }
 0x244   : > { %v784_v18 = vsub.f32 %v774_v11, %v783_v16 }
 0x246   : > { %v785_v19 = vmul.f32 1.442695, %v784_v18 }
 0x248   : > { %1920 = vpow2.f32 %v785_v19 }
 0x255   : > { %v1921_v20 = vpop.eup %1920 }
 0x256   : > { %v787_v21 = vsel %vm780_vm5, %v1921_v20, 0.0 }
 0x257   : > { %788 = vadd.xlane.f32.xlu0 %v787_v21 }
 0x2e0   : > { %v789_v26 = vpop.xlane.xlu0 %788 }
 0x2e1   : > { %1922 = vrcp.f32 %v789_v26  ;;  %v1238_v26 = vsel %vm733_vm3, %v1231_v24, 0 }
 0x2ee   : > { %v1923_v27 = vpop.eup %1922 }
 0x2ef   : > { %v791_v28 = vmul.f32 %v1923_v27, %v1921_v20 }
 0x2f1   : > { %v792_v30 = vpack.c.bf16 %v791_v28, %v791_v28 }
 0x2f3   : > { %1757 = vmatmul.mubr.msk.bf16.vlgmr.msra.gmra.mxu0 %vm780_vm5, %v792_v30 }
 0x2f4   : > { %1769 = vmatpush3.bf16.xpose.msra.mxu0 %v906_v31  ;;  %1770 = vmatprep.mubr.msk.bf16.mxu0 %vm2015_vm0, %v2014_v1 }
 0x2f5   : > { %1780 = vmatprep.subr.bf16.mxu0 %v2014_v1 }
 0x2fb   : > { %1771 = vmatmul.mubr.msk.bf16.vlgmr.msra.gmra.mxu0 %vm733_vm3, %v897_v32 }
 0x2fc   : > { %1781 = vmatpush3.bf16.msra.mxu0 %v1912_v33  ;;  %1784 = vmatprep.mubr.msk.bf16.mxu0 %vm2015_vm0, %v2014_v1 }
 0x2fd   : > { %1782 = vmatprep.subr.bf16.mxu0 %v2014_v1 }
 0x300   : > { %1783 = vmatpush3.bf16.msra.mxu0 %v1913_v34 }
 0x301   : > { %1794 = vmatprep.subr.bf16.mxu0 %v2014_v1 }
 0x303   : > { %1785 = vmatmul.mubr.msk.bf16.vlgmr.msra.gmra.mxu0 %vm203_vm1, %v2186_v17 }
 0x304   : > { %1795 = vmatpush3.bf16.msra.mxu0 %v1130_v36  ;;  %1796 = vmatprep.mubr.msk.bf16.mxu0 %vm2015_vm0, %v2014_v1 }
 0x305   : > { %1808 = vmatprep.subr.bf16.mxu0 %v2014_v1 }
 0x3b3   : > { %v2265_v37 = vpop.f32.mrf.mxu0 }
 0x3b5   : > { %v1758_v38 = vpop.f32.mrf.mxu0 }
 0x3b7   : > { %v837_v39 = vpop.f32.mrf.mxu0 }
 0x3b9   : > { %v1759_v40 = vpop.f32.mrf.mxu0 }
 0x3bb   : > { %v942_v41 = vpop.f32.mrf.mxu0 }
 0x3bc   : > { %v948_v42 = vsel %vm780_vm5, %v942_v41, -inf }
 0x3bd   : > { %949 = vmax.xlane.f32.xlu1 %v948_v42  ;;  %v1772_v43 = vpop.f32.mrf.mxu0 }
 0x3bf   : > { %v945_v44 = vpop.f32.mrf.mxu0 }
 0x3c1   : > { %v1773_v45 = vpop.f32.mrf.mxu0 }
 0x3c3   : > { %v1057_v51 = vpop.f32.mrf.mxu0 }
 0x3c4   : > { %v1063_v61 = vpack.c.bf16 %v1057_v51, %v1057_v51 }
 0x3c5   : > { %v1786_v52 = vpop.f32.mrf.mxu0 }
 0x3c7   : > { %v1060_v53 = vpop.f32.mrf.mxu0 }
 0x3c9   : > { %v1787_v54 = vpop.f32.mrf.mxu0 }
 0x446   : > { %v950_v46 = vpop.xlane.xlu1 %949 }
 0x447   : > { %v951_v47 = vsub.f32 %v942_v41, %v950_v46 }
 0x449   : > { %v952_v48 = vmul.f32 1.442695, %v951_v47  ;;  %v1916_v47 = vld [vmem:[%s2375_s2 + $0x18] sm:$0xff]  }
 0x44b   : > { %1924 = vpow2.f32 %v952_v48  ;;  %v1917_v48 = vld [vmem:[%s2375_s2 + $0x10] sm:$0xff]  }
 0x458   : > { %v1925_v49 = vpop.eup %1924 }
 0x459   : > { %v954_v50 = vsel %vm780_vm5, %v1925_v49, 0.0 }
 0x45a   : > { %955 = vadd.xlane.f32.xlu1 %v954_v50  ;;  %v1919_v50 = vld [vmem:[%s2375_s2] sm:$0xff]  }
 0x4e3   : > { %v956_v55 = vpop.xlane.xlu1 %955 }
 0x4e4   : > { %1926 = vrcp.f32 %v956_v55 }
 0x4f1   : > { %v1927_v56 = vpop.eup %1926 }
 0x4f2   : > { %v958_v57 = vmul.f32 %v1927_v56, %v1925_v49  ;;  %v1918_v49 = vld [vmem:[%s2375_s2 + $0x8] sm:$0xff]  }
 0x4f4   : > { %v959_v59 = vpack.c.bf16 %v958_v57, %v958_v57 }
 0x4f6   : > { %1777 = vmatmul.mubr.msk.bf16.vlgmr.msra.gmra.mxu1 %vm780_vm5, %v959_v59 }
 0x4f7   : > { %1789 = vmatpush3.bf16.xpose.msra.mxu1 %v1072_v60  ;;  %1790 = vmatprep.mubr.msk.bf16.mxu1 %vm2015_vm0, %v2014_v1 }
 0x4f8   : > { %1800 = vmatprep.subr.bf16.mxu1 %v2014_v1 }
 0x4fe   : > { %1791 = vmatmul.mubr.msk.bf16.vlgmr.msra.gmra.mxu1 %vm733_vm3, %v1063_v61 }
 0x4ff   : > { %1801 = vmatpush3.bf16.msra.mxu1 %v1914_v62  ;;  %1804 = vmatprep.mubr.msk.bf16.mxu1 %vm2015_vm0, %v2014_v1 }
 0x500   : > { %1802 = vmatprep.subr.bf16.mxu1 %v2014_v1 }
 0x503   : > { %1803 = vmatpush3.bf16.msra.mxu1 %v1915_v63 }
 0x504   : > { %1814 = vmatprep.subr.bf16.mxu1 %v2014_v1 }
 0x506   : > { %1805 = vmatmul.mubr.msk.bf16.vlgmr.msra.gmra.mxu1 %vm203_vm1, %v2186_v17 }
 0x507   : > { %1815 = vmatpush3.bf16.msra.mxu1 %v1296_v2  ;;  %1816 = vmatprep.mubr.msk.bf16.mxu1 %vm2015_vm0, %v2014_v1 }
 0x5b6   : > { %v1000_v3 = vpop.f32.mrf.mxu1 }
 0x5b8   : > { %v1778_v4 = vpop.f32.mrf.mxu1 }
 0x5ba   : > { %v1003_v5 = vpop.f32.mrf.mxu1 }
 0x5bc   : > { %v1779_v6 = vpop.f32.mrf.mxu1 }
 0x5be   : > { %v1108_v7 = vpop.f32.mrf.mxu1 }
 0x5bf   : > { %v1114_v8 = vsel %vm780_vm5, %v1108_v7, -inf }
 0x5c0   : > { %1115 = vmax.xlane.f32.xlu0 %v1114_v8  ;;  %v1792_v9 = vpop.f32.mrf.mxu1 }
 0x5c2   : > { %v1111_v10 = vpop.f32.mrf.mxu1 }
 0x5c4   : > { %v1793_v11 = vpop.f32.mrf.mxu1 }
 0x5c6   : > { %v1223_v16 = vpop.f32.mrf.mxu1 }
 0x5c7   : > { %v1229_v27 = vpack.c.bf16 %v1223_v16, %v1223_v16 }
 0x5c8   : > { %v1806_v18 = vpop.f32.mrf.mxu1 }
 0x5ca   : > { %v1226_v19 = vpop.f32.mrf.mxu1 }
 0x5cc   : > { %v1807_v20 = vpop.f32.mrf.mxu1 }
 0x649   : > { %v1116_v12 = vpop.xlane.xlu0 %1115 }
 0x64a   : > { %v1117_v13 = vsub.f32 %v1108_v7, %v1116_v12 }
 0x64c   : > { %v1118_v17 = vmul.f32 1.442695, %v1117_v13 }
 0x64e   : > { %1928 = vpow2.f32 %v1118_v17 }
 0x65b   : > { %v1929_v14 = vpop.eup %1928 }
 0x65c   : > { %v1120_v15 = vsel %vm780_vm5, %v1929_v14, 0.0 }
 0x65d   : > { %1121 = vadd.xlane.f32.xlu1 %v1120_v15 }
 0x6e6   : > { %v1122_v21 = vpop.xlane.xlu1 %1121 }
 0x6e7   : > { %1930 = vrcp.f32 %v1122_v21 }
 0x6f4   : > { %v1931_v22 = vpop.eup %1930 }
 0x6f5   : > { %v1124_v23 = vmul.f32 %v1931_v22, %v1929_v14 }
 0x6f7   : > { %v1125_v25 = vpack.c.bf16 %v1124_v23, %v1124_v23 }
 0x6f9   : > { %1797 = vmatmul.mubr.msk.bf16.vlgmr.msra.gmra.mxu0 %vm780_vm5, %v1125_v25 }
 0x6fa   : > { %1809 = vmatpush3.bf16.xpose.msra.mxu0 %v1238_v26  ;;  %1810 = vmatprep.mubr.msk.bf16.mxu0 %vm2015_vm0, %v2014_v1 }
 0x6fb   : > { %1820 = vmatprep.subr.bf16.mxu0 %v2014_v1 }
 0x701   : > { %1811 = vmatmul.mubr.msk.bf16.vlgmr.msra.gmra.mxu0 %vm733_vm3, %v1229_v27 }
 0x702   : > { %1828 = vmatprep.mubr.msk.bf16.mxu0 %vm2015_vm0, %v2014_v1  ;;  %1821 = vmatpush3.bf16.msra.mxu0 %v1916_v47 }
 0x703   : > { %1822 = vmatprep.subr.bf16.mxu0 %v2014_v1 }
 0x706   : > { %1823 = vmatpush3.bf16.msra.mxu0 %v1917_v48 }
 0x707   : > { %1824 = vmatprep.subr.bf16.mxu0 %v2014_v1 }
 0x70a   : > { %1825 = vmatpush3.bf16.msra.mxu0 %v1918_v49 }
 0x70b   : > { %1826 = vmatprep.subr.bf16.mxu0 %v2014_v1 }
 0x70e   : > { %1827 = vmatpush3.bf16.msra.mxu0 %v1919_v50 }
 0x7b9   : > { %v1166_v28 = vpop.f32.mrf.mxu0 }
 0x7bb   : > { %v1798_v29 = vpop.f32.mrf.mxu0 }
 0x7bd   : > { %v1169_v30 = vpop.f32.mrf.mxu0 }
 0x7bf   : > { %v1799_v31 = vpop.f32.mrf.mxu0 }
 0x7c1   : > { %v1274_v32 = vpop.f32.mrf.mxu0 }
 0x7c2   : > { %v1280_v33 = vsel %vm780_vm5, %v1274_v32, -inf }
 0x7c3   : > { %1281 = vmax.xlane.f32.xlu0 %v1280_v33  ;;  %v1812_v34 = vpop.f32.mrf.mxu0 }
 0x7c5   : > { %v1277_v35 = vpop.f32.mrf.mxu0 }
 0x7c7   : > { %v1813_v36 = vpop.f32.mrf.mxu0 }
 0x7d9   : > { %1339 = vrot.lane.b32.xlu0 %v1000_v3, %s2016_s29 }
 0x84c   : > { %v1282_v38 = vpop.xlane.xlu0 %1281 }
 0x84d   : > { %v1283_v39 = vsub.f32 %v1274_v32, %v1282_v38 }
 0x84f   : > { %v1284_v40 = vmul.f32 1.442695, %v1283_v39 }
 0x850   : > { %v1340_v55 = vpop.permute.xlu0 %1339 }
 0x851   : > { %1932 = vpow2.f32 %v1284_v40  ;;  %v1350_v57 = vsel %vm733_vm3, %v2265_v37, %v1340_v55 }
 0x85e   : > { %v1933_v41 = vpop.eup %1932 }
 0x85f   : > { %v1286_v42 = vsel %vm780_vm5, %v1933_v41, 0.0 }
 0x860   : > { %1287 = vadd.xlane.f32.xlu1 %v1286_v42 }
 0x871   : > { %1343 = vrot.lane.b32.xlu1 %v1166_v28, %s2017_s30  ;;  %s2326_s30 = scalar_lea.hbm %s2376_s3, %s1616_s23 }
 0x8e9   : > { %v1288_v43 = vpop.xlane.xlu1 %1287 }
 0x8ea   : > { %1934 = vrcp.f32 %v1288_v43 }
 0x8ed   : > { %v1344_v56 = vpop.permute.xlu1 %1343 }
 0x8ee   : > { %v1351_v1 = vsel %vm203_vm1, %v1350_v57, %v1344_v56 }
 0x8f7   : > { %v1935_v44 = vpop.eup %1934 }
 0x8f8   : > { %v1290_v45 = vmul.f32 %v1935_v44, %v1933_v41 }
 0x8fa   : > { %v1291_v46 = vpack.c.bf16 %v1290_v45, %v1290_v45 }
 0x8fc   : > { %1817 = vmatmul.mubr.msk.bf16.vlgmr.msra.gmra.mxu1 %vm780_vm5, %v1291_v46 }
 0x9bc   : > { %v1332_v51 = vpop.f32.mrf.mxu1 }
 0x9bd   : > { %1347 = vrot.lane.b32.xlu1 %v1332_v51, %s2018_s11 }
 0x9be   : > { %v1818_v52 = vpop.f32.mrf.mxu1 }
 0x9c0   : > { %v1335_v53 = vpop.f32.mrf.mxu1 }
 0x9c2   : > { %v1819_v54 = vpop.f32.mrf.mxu1 }
 0xa2f   : > { %v1348_v58 = vpop.permute.xlu1 %1347 }
 0xa30   : > { %v1353_v59 = vsel %vm1352_vm6, %v1351_v1, %v1348_v58 }
 0xa31   : > { %v1354_v60 = vpack.c.bf16 %v1353_v59, %v1353_v59 }
 0xa33   : > { %1829 = vmatmul.mubr.msk.bf16.vlgmr.msra.gmra.mxu0 %vm1387_vm7, %v1354_v60 }
 0xaf3   : > { %v1425_v37 = vpop.f32.mrf.mxu0 }
 0xaf4   : > { %1431 = vst.msk [vmem:[%s175_s26] sm:$0xff] %vm203_vm1, %v1425_v37 }
 0xaf5   : > { %v1830_v61 = vpop.f32.mrf.mxu0 }
 0xaf6   : > { %1949 = shalt.err (!%p1946_p5)
}
 0xaf7   : > { %s1950_s7 = scalar_lea.hbm %s2326_s30, 128  ;;  %s1954_s10 = scalar_lea.hbm %s2376_s3, 256 }
 0xaf8   : > { %p1951_p6 = scmp.ne.s32.totalorder %s2326_s30, %s1950_s7  ;;  %p1955_p10 = scmp.lt.s32.totalorder %s2326_s30, %s2376_s3 }
 0xaf9   : > { %p1956_p11 = scmp.lt.s32.totalorder %s1954_s10, %s1950_s7 }
 0xafa   : > { %p1952_p7 = pnand %p1951_p6, %p2080_p4 }
 0xafb   : > { %p1957_p12 = por %p1956_p11, %p1955_p10 }
 0xafc   : > { %p1953_p9 = pneg %p1952_p7 }
 0xafe   : > { %p1958_p13 = pnand %p1957_p12, %p1953_p9 }
 0xb00   : > { %1961 = shalt.err (!%p1958_p13)
}
 0xb01   : > { %1832 = dma.vmem_to_hbm [thread:$0]  (%p2080_p4), %s2328_s27, 128, %s2326_s30, %s1433_s19   ;;  %v1428_v62 = vpop.f32.mrf.mxu0 }
 0xb03   : > { %v1831_v63 = vpop.f32.mrf.mxu0 }
 0xb04 PF: > { %p1838_p0 = scmp.ge.s32.totalorder %s2012_s17, 2  ;;  %s1459_s21 = sand.u32 1, %s1992_s12  }
 0xb05   : > { %s1460_s23 = scalar_lea.sflag [#allocation5], %s1459_s21 }
 0xb06   : > { %p1835_p1 = pnand %p1838_p0, %p2087_p8 }
 0xb08   : > { %p1836_p2 = pneg %p1835_p1 }
 0xb0a   : > { %1987 = dma.done.wait (%p1836_p2), %s1460_s23, 128  }
 0xb0b   : > { %1989 = vsyncadd (%p1836_p2), %s1460_s23, 4294967168  ;;  %s16_s17 = sadd.s32 1, %s2012_s17   ;;  %s2379_s12 = smov %s1996_s13 }
 0xb0c   : > { %p13_p3 = scmp.ge.s32.totalorder %s16_s17, 4   ;;  %s2380_s13 = smov %s2000_s14 }
 0xb0d   : > { %s2381_s14 = smov %s2093_s25  ;;  %s2382_s15 = smov %s2008_s16 }
 0xb0e   : > { %s2383_s16 = smov %s2385_s20  ;;  %15 = sbr.rel (!%p13_p3) target bundleno = 4 (0x4), region = 94 }
 0xb13   :  { %1465 = vsyncpa [#allocation5], 1 }
 0xb14   :  { %1467 = vsyncpa [#allocation5 + $0x1], 1 }

</bundles_post_ra>
